<compile_context>
chip_gen: v6e
topology: v6e:2x2x1
jax: 0.10.0
libtpu: 0.0.40
codegen_flags: <defaults>
</compile_context>

<pallas_src>
import jax
import jax.numpy as jnp
from jax.experimental import pallas as pl
from jax.experimental.pallas import tpu as pltpu

HIDDEN_LAYERS = [64, 128, 128, 64, 32]


def mlp_kernel(x_ref, *refs):
  """x_ref: (F, tile_b) f32 tile of the transposed input.

  refs = (w0, b0, w1, b1, ..., wL, bL, out_ref) with
    w_i: (out_dim, in_dim) bf16   (native PyTorch layout)
    b_i: (out_dim, 1)      f32
    out_ref: (1, tile_b)   -- lane-dense output row.
  """
  out_ref = refs[-1]
  param_refs = refs[:-1]
  n_layers = len(param_refs) // 2

  h = x_ref[...].astype(jnp.float32)              # (F, tile_b)
  for i in range(n_layers):
    w = param_refs[2 * i][...]                    # (out, in) bf16
    b = param_refs[2 * i + 1][...]                # (out, 1)  f32
    # (out, in) @ (in, tile_b) -> (out, tile_b), f32 accumulation on the MXU.
    h = jnp.dot(w, h.astype(jnp.bfloat16),
                preferred_element_type=jnp.float32) + b
    if i < n_layers - 1:                          # no ReLU after final Linear
      h = jnp.maximum(h, 0.0)
  out_ref[...] = h.astype(out_ref.dtype)          # (1, tile_b) unmasked store


def _round_up(x, m):
  return ((x + m - 1) // m) * m


def _choose_tile_b(batch):
  """Batch tile: multiple of 128 (lane-dense), big enough to amortize per-step
  overhead, and yielding a >=2-step grid when possible (megacore sharding)."""
  b128 = _round_up(max(batch, 1), 128)
  if b128 <= 128:
    return 128
  tile = min(512, b128)
  if tile >= b128:                 # would be a 1-step grid -> split for 2 TCs
    tile = max(128, _round_up(b128 // 2, 128))
  return tile


def neural_imputation_forward(x, params, *, tile_b=None):
  """x: [B, num_features] f32. params: list of (W [out,in] f32, b [out] f32)."""
  B, F = x.shape
  if tile_b is None:
    tile_b = _choose_tile_b(B)

  # Transpose to (F, B) so batch lives on lanes; zero-pad batch to a tile
  # multiple (padded columns are sliced off afterwards).
  B_pad = _round_up(B, tile_b)
  x_t = x.T
  if B_pad != B:
    x_t = jnp.pad(x_t, ((0, 0), (0, B_pad - B)))
  grid = (B_pad // tile_b,)

  in_specs = [pl.BlockSpec((F, tile_b), lambda i: (0, i))]
  flat_params = []
  for (w, b) in params:
    w_bf16 = w.astype(jnp.bfloat16)            # (out, in), MXU operand
    b_col = b.reshape(-1, 1).astype(jnp.float32)   # (out, 1), f32 bias
    flat_params.append(w_bf16)
    flat_params.append(b_col)
    # Full blocks, constant index map -> resident across all grid steps.
    in_specs.append(pl.BlockSpec(w_bf16.shape, lambda i: (0, 0)))
    in_specs.append(pl.BlockSpec(b_col.shape, lambda i: (0, 0)))

  out_spec = pl.BlockSpec((1, tile_b), lambda i: (0, i))

  out = pl.pallas_call(
      mlp_kernel,
      out_shape=jax.ShapeDtypeStruct((1, B_pad), x.dtype),
      grid=grid,
      in_specs=in_specs,
      out_specs=out_spec,
      compiler_params=pltpu.CompilerParams(
          dimension_semantics=("parallel",),
          # Safe on every generation (v5e default scoped VMEM is 16 MiB,
          # v7x physical is 64 MiB); our footprint is well under 1 MiB.
          vmem_limit_bytes=32 * 1024 * 1024,
      ),
  )(x_t, *flat_params)

  return out.reshape(B_pad, 1)[:B]


def init_params(key, num_features, hidden_layers):
  """PyTorch-style Linear init: W [out, in], b [out], f32 masters."""
  dims = [num_features] + list(hidden_layers) + [1]
  params = []
  for i in range(len(dims) - 1):
    fan_in, fan_out = dims[i], dims[i + 1]
    key, k_w, k_b = jax.random.split(key, 3)
    bound = 1.0 / jnp.sqrt(jnp.float32(fan_in))
    w = jax.random.uniform(k_w, (fan_out, fan_in), jnp.float32, -bound, bound)
    b = jax.random.uniform(k_b, (fan_out,), jnp.float32, -bound, bound)
    params.append((w, b))
  return params


def reference_forward_f32(x, params):
  """Full-f32 reference (original PyTorch semantics: h @ W^T + b)."""
  h = x
  n = len(params)
  for i, (w, b) in enumerate(params):
    h = h @ w.T + b[None, :]
    if i < n - 1:
      h = jnp.maximum(h, 0.0)
  return h


def reference_forward_bf16(x, params):
  """Reference emulating the kernel's numerics: transposed compute, bf16
  operands, f32 accumulation."""
  h = x.T.astype(jnp.float32)
  n = len(params)
  for i, (w, b) in enumerate(params):
    h = jnp.dot(w.astype(jnp.bfloat16), h.astype(jnp.bfloat16),
                preferred_element_type=jnp.float32) + b[:, None].astype(jnp.float32)
    if i < n - 1:
      h = jnp.maximum(h, 0.0)
  return h.T


if __name__ == "__main__":
  key = jax.random.PRNGKey(0)
  k_x, k_p = jax.random.split(key)

  num_features = 16
  batch = 256  # small, but large enough for a 2-step (megacore-shardable) grid

  x = jax.random.normal(k_x, (batch, num_features), dtype=jnp.float32)
  params = init_params(k_p, num_features, HIDDEN_LAYERS)

  out = neural_imputation_forward(x, params)
  out = jax.block_until_ready(out)
  assert out.shape == (batch, 1), out.shape

  # Tight check vs a reference with identical numerics (bf16 operands,
  # f32 accumulation).
  ref_bf16 = reference_forward_bf16(x, params)
  err_bf16 = jnp.max(jnp.abs(out - ref_bf16))
  assert jnp.allclose(out, ref_bf16, atol=5e-3, rtol=5e-3), (
      f"max abs err vs bf16-emulated reference: {err_bf16}")

  # Looser sanity check vs the full-f32 PyTorch-equivalent forward.
  ref_f32 = reference_forward_f32(x, params)
  err_f32 = jnp.max(jnp.abs(out - ref_f32))
  assert jnp.allclose(out, ref_f32, atol=1e-1, rtol=1e-1), (
      f"max abs err vs f32 reference: {err_f32}")

  print("KERNEL_OK")
</pallas_src>

<mosaic_0001>
module attributes {stable_mosaic.version = 11 : i64} {
  func.func @mlp_kernel(%arg0: i32, %arg1: memref<16x128xf32, #tpu.memory_space<vmem>>, %arg2: memref<64x16xbf16, #tpu.memory_space<vmem>>, %arg3: memref<64x1xf32, #tpu.memory_space<vmem>>, %arg4: memref<128x64xbf16, #tpu.memory_space<vmem>>, %arg5: memref<128x1xf32, #tpu.memory_space<vmem>>, %arg6: memref<128x128xbf16, #tpu.memory_space<vmem>>, %arg7: memref<128x1xf32, #tpu.memory_space<vmem>>, %arg8: memref<64x128xbf16, #tpu.memory_space<vmem>>, %arg9: memref<64x1xf32, #tpu.memory_space<vmem>>, %arg10: memref<32x64xbf16, #tpu.memory_space<vmem>>, %arg11: memref<32x1xf32, #tpu.memory_space<vmem>>, %arg12: memref<1x32xbf16, #tpu.memory_space<vmem>>, %arg13: memref<1x1xf32, #tpu.memory_space<vmem>>, %arg14: memref<1x128xf32, #tpu.memory_space<vmem>>) attributes {dimension_semantics = [#tpu.dimension_semantics<parallel>], iteration_bounds = array<i64: 2>, scalar_prefetch = 0 : i64, scratch_operands = 0 : i64, tpu.core_type = #tpu.core_type<tc>, window_params = [{transform_indices = @transform_0, window_bounds = array<i64: 16, 128>}, {pipeline_mode = #tpu.pipeline_mode<synchronous>, transform_indices = @transform_1, window_bounds = array<i64: 64, 16>}, {pipeline_mode = #tpu.pipeline_mode<synchronous>, transform_indices = @transform_2, window_bounds = array<i64: 64, 1>}, {pipeline_mode = #tpu.pipeline_mode<synchronous>, transform_indices = @transform_3, window_bounds = array<i64: 128, 64>}, {pipeline_mode = #tpu.pipeline_mode<synchronous>, transform_indices = @transform_4, window_bounds = array<i64: 128, 1>}, {pipeline_mode = #tpu.pipeline_mode<synchronous>, transform_indices = @transform_5, window_bounds = array<i64: 128, 128>}, {pipeline_mode = #tpu.pipeline_mode<synchronous>, transform_indices = @transform_6, window_bounds = array<i64: 128, 1>}, {pipeline_mode = #tpu.pipeline_mode<synchronous>, transform_indices = @transform_7, window_bounds = array<i64: 64, 128>}, {pipeline_mode = #tpu.pipeline_mode<synchronous>, transform_indices = @transform_8, window_bounds = array<i64: 64, 1>}, {pipeline_mode = #tpu.pipeline_mode<synchronous>, transform_indices = @transform_9, window_bounds = array<i64: 32, 64>}, {pipeline_mode = #tpu.pipeline_mode<synchronous>, transform_indices = @transform_10, window_bounds = array<i64: 32, 1>}, {pipeline_mode = #tpu.pipeline_mode<synchronous>, transform_indices = @transform_11, window_bounds = array<i64: 1, 32>}, {pipeline_mode = #tpu.pipeline_mode<synchronous>, transform_indices = @transform_12, window_bounds = array<i64: 1, 1>}, {transform_indices = @transform_13, window_bounds = array<i64: 1, 128>}]} {
    %c0 = arith.constant 0 : index
    %c0_0 = arith.constant 0 : index
    %0 = vector.load %arg1[%c0, %c0_0] : memref<16x128xf32, #tpu.memory_space<vmem>>, vector<16x128xf32>
    %c0_1 = arith.constant 0 : index
    %c0_2 = arith.constant 0 : index
    %1 = vector.load %arg2[%c0_1, %c0_2] : memref<64x16xbf16, #tpu.memory_space<vmem>>, vector<64x16xbf16>
    %c0_3 = arith.constant 0 : index
    %c0_4 = arith.constant 0 : index
    %2 = vector.load %arg3[%c0_3, %c0_4] : memref<64x1xf32, #tpu.memory_space<vmem>>, vector<64x1xf32>
    %3 = arith.truncf %0 : vector<16x128xf32> to vector<16x128xbf16>
    %cst = arith.constant dense<0.000000e+00> : vector<64x128xf32>
    %4 = tpu.matmul %1, %3, %cst {dimension_numbers = #tpu.dot_dimension_numbers<[1], [0], [0], [1], [0, 0, 1, 1], [], []>} : vector<64x16xbf16>, vector<16x128xbf16>, vector<64x128xf32> -> vector<64x128xf32>
    %5 = vector.broadcast %2 : vector<64x1xf32> to vector<64x128xf32>
    %6 = arith.addf %4, %5 : vector<64x128xf32>
    %cst_5 = arith.constant 0.000000e+00 : f32
    %7 = vector.broadcast %cst_5 : f32 to vector<64x128xf32>
    %8 = arith.maximumf %6, %7 : vector<64x128xf32>
    %c0_6 = arith.constant 0 : index
    %c0_7 = arith.constant 0 : index
    %9 = vector.load %arg4[%c0_6, %c0_7] : memref<128x64xbf16, #tpu.memory_space<vmem>>, vector<128x64xbf16>
    %c0_8 = arith.constant 0 : index
    %c0_9 = arith.constant 0 : index
    %10 = vector.load %arg5[%c0_8, %c0_9] : memref<128x1xf32, #tpu.memory_space<vmem>>, vector<128x1xf32>
    %11 = arith.truncf %8 : vector<64x128xf32> to vector<64x128xbf16>
    %cst_10 = arith.constant dense<0.000000e+00> : vector<128x128xf32>
    %12 = tpu.matmul %9, %11, %cst_10 {dimension_numbers = #tpu.dot_dimension_numbers<[1], [0], [0], [1], [0, 0, 1, 1], [], []>} : vector<128x64xbf16>, vector<64x128xbf16>, vector<128x128xf32> -> vector<128x128xf32>
    %13 = vector.broadcast %10 : vector<128x1xf32> to vector<128x128xf32>
    %14 = arith.addf %12, %13 : vector<128x128xf32>
    %cst_11 = arith.constant 0.000000e+00 : f32
    %15 = vector.broadcast %cst_11 : f32 to vector<128x128xf32>
    %16 = arith.maximumf %14, %15 : vector<128x128xf32>
    %c0_12 = arith.constant 0 : index
    %c0_13 = arith.constant 0 : index
    %17 = vector.load %arg6[%c0_12, %c0_13] : memref<128x128xbf16, #tpu.memory_space<vmem>>, vector<128x128xbf16>
    %c0_14 = arith.constant 0 : index
    %c0_15 = arith.constant 0 : index
    %18 = vector.load %arg7[%c0_14, %c0_15] : memref<128x1xf32, #tpu.memory_space<vmem>>, vector<128x1xf32>
    %19 = arith.truncf %16 : vector<128x128xf32> to vector<128x128xbf16>
    %cst_16 = arith.constant dense<0.000000e+00> : vector<128x128xf32>
    %20 = tpu.matmul %17, %19, %cst_16 {dimension_numbers = #tpu.dot_dimension_numbers<[1], [0], [0], [1], [0, 0, 1, 1], [], []>} : vector<128x128xbf16>, vector<128x128xbf16>, vector<128x128xf32> -> vector<128x128xf32>
    %21 = vector.broadcast %18 : vector<128x1xf32> to vector<128x128xf32>
    %22 = arith.addf %20, %21 : vector<128x128xf32>
    %cst_17 = arith.constant 0.000000e+00 : f32
    %23 = vector.broadcast %cst_17 : f32 to vector<128x128xf32>
    %24 = arith.maximumf %22, %23 : vector<128x128xf32>
    %c0_18 = arith.constant 0 : index
    %c0_19 = arith.constant 0 : index
    %25 = vector.load %arg8[%c0_18, %c0_19] : memref<64x128xbf16, #tpu.memory_space<vmem>>, vector<64x128xbf16>
    %c0_20 = arith.constant 0 : index
    %c0_21 = arith.constant 0 : index
    %26 = vector.load %arg9[%c0_20, %c0_21] : memref<64x1xf32, #tpu.memory_space<vmem>>, vector<64x1xf32>
    %27 = arith.truncf %24 : vector<128x128xf32> to vector<128x128xbf16>
    %cst_22 = arith.constant dense<0.000000e+00> : vector<64x128xf32>
    %28 = tpu.matmul %25, %27, %cst_22 {dimension_numbers = #tpu.dot_dimension_numbers<[1], [0], [0], [1], [0, 0, 1, 1], [], []>} : vector<64x128xbf16>, vector<128x128xbf16>, vector<64x128xf32> -> vector<64x128xf32>
    %29 = vector.broadcast %26 : vector<64x1xf32> to vector<64x128xf32>
    %30 = arith.addf %28, %29 : vector<64x128xf32>
    %cst_23 = arith.constant 0.000000e+00 : f32
    %31 = vector.broadcast %cst_23 : f32 to vector<64x128xf32>
    %32 = arith.maximumf %30, %31 : vector<64x128xf32>
    %c0_24 = arith.constant 0 : index
    %c0_25 = arith.constant 0 : index
    %33 = vector.load %arg10[%c0_24, %c0_25] : memref<32x64xbf16, #tpu.memory_space<vmem>>, vector<32x64xbf16>
    %c0_26 = arith.constant 0 : index
    %c0_27 = arith.constant 0 : index
    %34 = vector.load %arg11[%c0_26, %c0_27] : memref<32x1xf32, #tpu.memory_space<vmem>>, vector<32x1xf32>
    %35 = arith.truncf %32 : vector<64x128xf32> to vector<64x128xbf16>
    %cst_28 = arith.constant dense<0.000000e+00> : vector<32x128xf32>
    %36 = tpu.matmul %33, %35, %cst_28 {dimension_numbers = #tpu.dot_dimension_numbers<[1], [0], [0], [1], [0, 0, 1, 1], [], []>} : vector<32x64xbf16>, vector<64x128xbf16>, vector<32x128xf32> -> vector<32x128xf32>
    %37 = vector.broadcast %34 : vector<32x1xf32> to vector<32x128xf32>
    %38 = arith.addf %36, %37 : vector<32x128xf32>
    %cst_29 = arith.constant 0.000000e+00 : f32
    %39 = vector.broadcast %cst_29 : f32 to vector<32x128xf32>
    %40 = arith.maximumf %38, %39 : vector<32x128xf32>
    %c0_30 = arith.constant 0 : index
    %c0_31 = arith.constant 0 : index
    %41 = vector.load %arg12[%c0_30, %c0_31] : memref<1x32xbf16, #tpu.memory_space<vmem>>, vector<1x32xbf16>
    %c0_32 = arith.constant 0 : index
    %c0_33 = arith.constant 0 : index
    %42 = vector.load %arg13[%c0_32, %c0_33] : memref<1x1xf32, #tpu.memory_space<vmem>>, vector<1x1xf32>
    %43 = arith.truncf %40 : vector<32x128xf32> to vector<32x128xbf16>
    %cst_34 = arith.constant dense<0.000000e+00> : vector<1x128xf32>
    %44 = tpu.matmul %41, %43, %cst_34 {dimension_numbers = #tpu.dot_dimension_numbers<[1], [0], [0], [1], [0, 0, 1, 1], [], []>} : vector<1x32xbf16>, vector<32x128xbf16>, vector<1x128xf32> -> vector<1x128xf32>
    %45 = vector.broadcast %42 : vector<1x1xf32> to vector<1x128xf32>
    %46 = arith.addf %44, %45 : vector<1x128xf32>
    %c0_35 = arith.constant 0 : index
    %c0_36 = arith.constant 0 : index
    %47 = vector.load %arg14[%c0_35, %c0_36] : memref<1x128xf32, #tpu.memory_space<vmem>>, vector<1x128xf32>
    tpu.vector_store %arg14[%c0_35, %c0_36], %46 {strides = array<i32>} : memref<1x128xf32, #tpu.memory_space<vmem>>, vector<1x128xf32>,
    return
  }
  func.func @transform_0(%arg0: i32) -> (i32, i32) {
    %c0_i32 = arith.constant 0 : i32
    %c0_i32_0 = arith.constant 0 : i32
    return %c0_i32, %arg0 : i32, i32
  }
  func.func @transform_1(%arg0: i32) -> (i32, i32) {
    %c0_i32 = arith.constant 0 : i32
    %c0_i32_0 = arith.constant 0 : i32
    %c0_i32_1 = arith.constant 0 : i32
    return %c0_i32, %c0_i32_0 : i32, i32
  }
  func.func @transform_2(%arg0: i32) -> (i32, i32) {
    %c0_i32 = arith.constant 0 : i32
    %c0_i32_0 = arith.constant 0 : i32
    %c0_i32_1 = arith.constant 0 : i32
    return %c0_i32, %c0_i32_0 : i32, i32
  }
  func.func @transform_3(%arg0: i32) -> (i32, i32) {
    %c0_i32 = arith.constant 0 : i32
    %c0_i32_0 = arith.constant 0 : i32
    %c0_i32_1 = arith.constant 0 : i32
    return %c0_i32, %c0_i32_0 : i32, i32
  }
  func.func @transform_4(%arg0: i32) -> (i32, i32) {
    %c0_i32 = arith.constant 0 : i32
    %c0_i32_0 = arith.constant 0 : i32
    %c0_i32_1 = arith.constant 0 : i32
    return %c0_i32, %c0_i32_0 : i32, i32
  }
  func.func @transform_5(%arg0: i32) -> (i32, i32) {
    %c0_i32 = arith.constant 0 : i32
    %c0_i32_0 = arith.constant 0 : i32
    %c0_i32_1 = arith.constant 0 : i32
    return %c0_i32, %c0_i32_0 : i32, i32
  }
  func.func @transform_6(%arg0: i32) -> (i32, i32) {
    %c0_i32 = arith.constant 0 : i32
    %c0_i32_0 = arith.constant 0 : i32
    %c0_i32_1 = arith.constant 0 : i32
    return %c0_i32, %c0_i32_0 : i32, i32
  }
  func.func @transform_7(%arg0: i32) -> (i32, i32) {
    %c0_i32 = arith.constant 0 : i32
    %c0_i32_0 = arith.constant 0 : i32
    %c0_i32_1 = arith.constant 0 : i32
    return %c0_i32, %c0_i32_0 : i32, i32
  }
  func.func @transform_8(%arg0: i32) -> (i32, i32) {
    %c0_i32 = arith.constant 0 : i32
    %c0_i32_0 = arith.constant 0 : i32
    %c0_i32_1 = arith.constant 0 : i32
    return %c0_i32, %c0_i32_0 : i32, i32
  }
  func.func @transform_9(%arg0: i32) -> (i32, i32) {
    %c0_i32 = arith.constant 0 : i32
    %c0_i32_0 = arith.constant 0 : i32
    %c0_i32_1 = arith.constant 0 : i32
    return %c0_i32, %c0_i32_0 : i32, i32
  }
  func.func @transform_10(%arg0: i32) -> (i32, i32) {
    %c0_i32 = arith.constant 0 : i32
    %c0_i32_0 = arith.constant 0 : i32
    %c0_i32_1 = arith.constant 0 : i32
    return %c0_i32, %c0_i32_0 : i32, i32
  }
  func.func @transform_11(%arg0: i32) -> (i32, i32) {
    %c0_i32 = arith.constant 0 : i32
    %c0_i32_0 = arith.constant 0 : i32
    %c0_i32_1 = arith.constant 0 : i32
    return %c0_i32, %c0_i32_0 : i32, i32
  }
  func.func @transform_12(%arg0: i32) -> (i32, i32) {
    %c0_i32 = arith.constant 0 : i32
    %c0_i32_0 = arith.constant 0 : i32
    %c0_i32_1 = arith.constant 0 : i32
    return %c0_i32, %c0_i32_0 : i32, i32
  }
  func.func @transform_13(%arg0: i32) -> (i32, i32) {
    %c0_i32 = arith.constant 0 : i32
    %c0_i32_0 = arith.constant 0 : i32
    return %c0_i32, %arg0 : i32, i32
  }
}

</mosaic_0001>

<bundles_post_ra>
// kernel: tpu_custom_call.1
= control target key start
LH: loop header
LB: loop body
LE: loop exit
PB: predicated region body
PF: predicated region fallthrough
CT: control target
= control target key end

     0   :  { %s2416_s0 = inlined_call_operand.vmem [shape: f32[16,256], index: 0, kind: input, shape index: {}]   ;;  %s2417_s1 = inlined_call_operand.vmem [shape: bf16[64,16], index: 1, kind: input, shape index: {}]   ;;  %s2418_s2 = inlined_call_operand.vmem [shape: f32[64,1], index: 2, kind: input, shape index: {}]   ;;  %s2419_s3 = inlined_call_operand.vmem [shape: bf16[128,64], index: 3, kind: input, shape index: {}]   ;;  %s2420_s4 = inlined_call_operand.vmem [shape: f32[128,1], index: 4, kind: input, shape index: {}]   ;;  %s2421_s5 = inlined_call_operand.vmem [shape: bf16[128,128], index: 5, kind: input, shape index: {}]   ;;  %s2422_s6 = inlined_call_operand.vmem [shape: f32[128,1], index: 6, kind: input, shape index: {}]   ;;  %s2423_s7 = inlined_call_operand.vmem [shape: bf16[64,128], index: 7, kind: input, shape index: {}]   ;;  %s2424_s8 = inlined_call_operand.vmem [shape: f32[64,1], index: 8, kind: input, shape index: {}]   ;;  %s2425_s9 = inlined_call_operand.vmem [shape: bf16[32,64], index: 9, kind: input, shape index: {}]   ;;  %s2426_s10 = inlined_call_operand.vmem [shape: f32[32,1], index: 10, kind: input, shape index: {}]   ;;  %s2427_s11 = inlined_call_operand.vmem [shape: bf16[1,32], index: 11, kind: input, shape index: {}]   ;;  %s2428_s12 = inlined_call_operand.<no memory space> [shape: f32[1,1], index: 12, kind: input, shape index: {}]   ;;  %s2429_s13 = inlined_call_operand.hbm [shape: f32[1,256], index: 13, kind: output, shape index: {}]  }
   0x1   :  { %2431 = sst [smem:[#allocation7_spill]] %s2416_s0  ;;  %v18_v0 = vstv %s2428_s12 }
   0x2   :  { %2432 = sst [smem:[#allocation8_spill]] %s2417_s1  ;;  %19 = vst [vmem:[#allocation2] sm:$0x1] %v18_v0 }
   0x3   :  { %20 = vsyncpa [#allocation5], 0 }
   0x4   :  { %22 = vsyncpa [#allocation5 + $0x1], 0  ;;  %s2038_s27 = smov 0   ;;  %s2040_s28 = smov 0  }
   0x5   :  { %s2042_s29 = smov 0   ;;  %s2044_s30 = smov 0  }
   0x6 LB: > { %s2430_s12 = sadd.s32 4294967295, %s1959_s30   ;;  %s1614_s14 = sadd.s32 4294967294, %s1959_s30   ;;  %s1959_s30 = sphi %s2044_s30, %s2441_s30   ;;  %s1955_s29 = sphi %s2042_s29, %s2440_s29   ;;  %s1951_s28 = sphi %s2040_s28, %s2439_s28   ;;  %s1947_s27 = sphi %s2038_s27, %s2438_s27  }
   0x7   : > { %s2061_s15 = sadd.s32 1, %s1959_s30   ;;  %s35_s16 = sadd.s32 1, %s1955_s29 }
   0x8   : > { %s32_s17 = ssub.s32 %s1959_s30, %s2061_s15  ;;  %p42_p0 = scmp.ne.s32.totalorder %s1955_s29, %s1951_s28 }
   0x9   : > { %p33_p1 = scmp.eq.s32.totalorder %s32_s17, 0  ;;  %p43_p2 = scmp.eq.s32.totalorder %s1959_s30, 0 }
   0xa   : > { %p324_p3 = scmp.eq.s32.totalorder %s2430_s12, 1  ;;  %p329_p4 = scmp.ne.s32.totalorder %s1951_s28, %s1947_s27 }
   0xb   : > { %s2074_s18 = scalar_select %p33_p1, %s1955_s29, %s35_s16  }
   0xc   : > { %p44_p5 = por %p43_p2, %p42_p0  ;;  %p2076_p6 = por %p324_p3, %p42_p0 }
   0xd   : > { %p330_p7 = scmp.eq.s32.totalorder %s1614_s14, 1  ;;  %p1616_p9 = scmp.ge.s32.totalorder %s1959_s30, 2 }
   0xf   : > { %p2080_p8 = por %p330_p7, %p329_p4  ;;  %382 = sbr.rel (%p1616_p9) target bundleno = 31 (0x1f), region = 64 }
  0x14   : > { %385 = sbr.rel (!%p44_p5) target bundleno = 31 (0x1f), region = 68  ;;  %s387_s21 = sand.u32 (%p44_p5), 1, %s1955_s29  }
  0x15   : > { %s1618_s22 = sshll.u32 (%p44_p5), %s1959_s30, 3  ;;  %s1617_s23 = sshll.u32 (%p44_p5), %s387_s21, 4 }
  0x16   : > { %s2435_s0 = sld [smem:[#allocation7_spill]] (%p44_p5)  ;;  %s389_s14 = scalar_lea.vmem (%p44_p5), [#allocation3], %s1617_s23 }
  0x1c   : > { %s391_s26 = scalar_lea.vmem %s2435_s0, %s1618_s22 }
  0x1d   : > { %v422_v1 = vld [vmem:[%s391_s26] sm:$0xff]  ;;  %v424_v2 = vld [vmem:[%s391_s26 + $0x10] sm:$0xff] }
  0x1e   : > { %423 = vst [vmem:[%s389_s14] sm:$0xff] %v422_v1  ;;  %425 = vst [vmem:[%s389_s14 + $0x8] sm:$0xff] %v424_v2 }
  0x1f PF: > { %p1619_p10 = scmp.ge.s32.totalorder %s1959_s30, 1  ;;  %p430_p11 = scmp.lt.s32.totalorder %s1959_s30, 3 }
  0x21   : > { %p431_p12 = pnand %p1619_p10, %p430_p11 }
  0x22   : > { %s2101_s23 = sand.u32 (!%p431_p12), 1, %s1951_s28   ;;  %s2436_s1 = sld [smem:[#allocation8_spill]] (!%p431_p12) }
  0x23   : > { %434 = sbr.rel (%p431_p12) target bundleno = 1442 (0x5a2), region = 106  ;;  %s1620_s24 = sshll.u32 (!%p431_p12), %s2101_s23, 4 }
  0x24   : > { %s439_s22 = scalar_lea.vmem (!%p431_p12), [#allocation3], %s1620_s24  ;;  %s2437_s0 = sadd.s32 (!%p431_p12), 4294967295, %s1959_s30  }
  0x25   : > { %s1662_s12 = sshll.u32 (!%p431_p12), %s2437_s0, 4  ;;  %s478_s21 = scalar_lea.vmem (!%p431_p12), [#allocation4], %s2101_s23 }
  0x26   : > { %s2373_s14 = scalar_lea.hbm (!%p431_p12), %s2429_s13, %s1662_s12  ;;  %s1541_s16 = scalar_lea.sflag (!%p431_p12), [#allocation5], %s2101_s23 }
  0x27   : > { %s1964_s17 = smov (!%p431_p12), [#allocation4]  }
  0x28   : > { %v496_v3 = vld [vmem:[%s2418_s2 + $0x30] sm:$0xff]  ;;  %v494_v4 = vld [vmem:[%s2418_s2 + $0x20] sm:$0xff]  ;;  %v1961_v5 = vmov 0   ;;  %vm559_vm0 = vcmask 130048   ;;  %v497_v6 = vld [vmem:[%s2418_s2 + $0x38] sm:$0xff]  ;;  %vm801_vm1 = vcmask 523264  }
  0x29   : > { %1872 = vset.pattern.permute.xlu1 %v1961_v5  ;;  %1871 = vset.pattern.permute.xlu0 %v1961_v5  ;;  %v495_v7 = vld [vmem:[%s2418_s2 + $0x28] sm:$0xff]  ;;  %v1873_v8 = vld [vmem:[%s2436_s1] sm:$0xff]   ;;  %v493_v12 = vld [vmem:[%s2418_s2 + $0x18] sm:$0xff]  ;;  %vm1963_vm2 = vmmov 0   ;;  %vm1495_vm3 = vcmask 261120   ;;  %s1903_s0 = sshll.u32 %s1964_s17, 4  ;;  %s1904_s0 = int_to_ptr.vmem [resolvable:$false] %s1903_s0 }
  0x2a   : > { %531 = vperm.xlu0 %1871, %v496_v3   ;;  %521 = vperm.xlu1 %1872, %v494_v4   ;;  %v480_v9 = vld [vmem:[%s439_s22] sm:$0xff]  ;;  %v481_v10 = vld [vmem:[%s439_s22 + $0x8] sm:$0xff]  ;;  %s1553_s22 = sshll.u32 %s478_s21, 4  ;;  %s1905_s25 = scalar_lea.vmem %s1904_s0, 32  ;;  %s2375_s22 = int_to_ptr.vmem [resolvable:$true] %s1553_s22 }
  0x2b   : > { %v498_v11 = vpack.c.bf16 %v481_v10, %v480_v9  ;;  %1721 = vmatprep.mubr.msk.bf16.mxu0 %vm559_vm0, %v1873_v8  ;;  %v492_v13 = vld [vmem:[%s2418_s2 + $0x10] sm:$0xff]  ;;  %v1874_v14 = vld [vmem:[%s2436_s1 + $0x8] sm:$0xff]   ;;  %v490_v17 = vld [vmem:[%s2418_s2] sm:$0xff]  ;;  %s1899_s24 = scalar_lea.vmem %s2375_s22, 16  ;;  %p1906_p2 = scmp.lt.s32.totalorder %s2375_s22, %s1904_s0 }
  0x2c   : > { %v1875_v15 = vld [vmem:[%s2436_s1 + $0x10] sm:$0xff]   ;;  %v491_v16 = vld [vmem:[%s2418_s2 + $0x8] sm:$0xff]  ;;  %v676_v18 = vld [vmem:[%s2420_s4 + $0x78] sm:$0xff]  ;;  %p1900_p13 = scmp.ne.s32.totalorder %s2375_s22, %s1899_s24  ;;  %p1907_p3 = scmp.lt.s32.totalorder %s1905_s25, %s1899_s24 }
  0x2d   : > { %1719 = vmatprep.subr.bf16.mxu0 %v498_v11  ;;  %v675_v19 = vld [vmem:[%s2420_s4 + $0x70] sm:$0xff]  ;;  %v1876_v20 = vld [vmem:[%s2436_s1 + $0x18] sm:$0xff]   ;;  %v674_v21 = vld [vmem:[%s2420_s4 + $0x68] sm:$0xff] }
  0x2e   : > { %536 = vperm.xlu0 %1871, %v497_v6   ;;  %526 = vperm.xlu1 %1872, %v495_v7   ;;  %v673_v22 = vld [vmem:[%s2420_s4 + $0x60] sm:$0xff]  ;;  %v672_v23 = vld [vmem:[%s2420_s4 + $0x58] sm:$0xff]  ;;  %v671_v24 = vld [vmem:[%s2420_s4 + $0x50] sm:$0xff]  ;;  %p1901_p0 = pnand %p1900_p13, %p2076_p6  ;;  %p1908_p4 = por %p1907_p3, %p1906_p2 }
  0x2f   : > { %1720 = vmatpush3.bf16.msra.mxu0 %v498_v11  ;;  %v670_v25 = vld [vmem:[%s2420_s4 + $0x48] sm:$0xff]  ;;  %v669_v26 = vld [vmem:[%s2420_s4 + $0x40] sm:$0xff]  ;;  %v668_v27 = vld [vmem:[%s2420_s4 + $0x38] sm:$0xff] }
  0x30   : > { %v667_v28 = vld [vmem:[%s2420_s4 + $0x30] sm:$0xff]  ;;  %v666_v29 = vld [vmem:[%s2420_s4 + $0x28] sm:$0xff]  ;;  %v665_v30 = vld [vmem:[%s2420_s4 + $0x20] sm:$0xff]  ;;  %p1902_p1 = pneg %p1901_p0 }
  0x31   : > { %v664_v31 = vld [vmem:[%s2420_s4 + $0x18] sm:$0xff]  ;;  %v663_v32 = vld [vmem:[%s2420_s4 + $0x10] sm:$0xff]  ;;  %v662_v33 = vld [vmem:[%s2420_s4 + $0x8] sm:$0xff] }
  0x32   : > { %516 = vperm.xlu1 %1872, %v493_v12   ;;  %511 = vperm.xlu0 %1871, %v492_v13   ;;  %v661_v34 = vld [vmem:[%s2420_s4] sm:$0xff]  ;;  %v970_v35 = vld [vmem:[%s2422_s6 + $0x78] sm:$0xff]  ;;  %v969_v36 = vld [vmem:[%s2422_s6 + $0x70] sm:$0xff]  ;;  %p1909_p5 = pnand %p1908_p4, %p1902_p1 }
  0x33   : > { %1722 = vmatmul.mubr.msk.bf16.vlgmr.msra.gmra.mxu0 %vm559_vm0, %v1874_v14  ;;  %v968_v37 = vld [vmem:[%s2422_s6 + $0x68] sm:$0xff]  ;;  %v967_v38 = vld [vmem:[%s2422_s6 + $0x60] sm:$0xff]  ;;  %v966_v39 = vld [vmem:[%s2422_s6 + $0x58] sm:$0xff] }
  0x34   : > { %1725 = vmatprep.mubr.msk.bf16.mxu0 %vm559_vm0, %v1875_v15  ;;  %v965_v40 = vld [vmem:[%s2422_s6 + $0x50] sm:$0xff]  ;;  %v964_v41 = vld [vmem:[%s2422_s6 + $0x48] sm:$0xff]  ;;  %v963_v42 = vld [vmem:[%s2422_s6 + $0x40] sm:$0xff] }
  0x35   : > { %v962_v43 = vld [vmem:[%s2422_s6 + $0x38] sm:$0xff]  ;;  %v961_v44 = vld [vmem:[%s2422_s6 + $0x30] sm:$0xff]  ;;  %v960_v45 = vld [vmem:[%s2422_s6 + $0x28] sm:$0xff] }
  0x36   : > { %506 = vperm.xlu1 %1872, %v491_v16   ;;  %501 = vperm.xlu0 %1871, %v490_v17   ;;  %v959_v46 = vld [vmem:[%s2422_s6 + $0x20] sm:$0xff]  ;;  %v958_v47 = vld [vmem:[%s2422_s6 + $0x18] sm:$0xff]  ;;  %v957_v48 = vld [vmem:[%s2422_s6 + $0x10] sm:$0xff] }
  0x37   : > { %v956_v49 = vld [vmem:[%s2422_s6 + $0x8] sm:$0xff]  ;;  %v955_v50 = vld [vmem:[%s2422_s6] sm:$0xff]  ;;  %v1235_v51 = vld [vmem:[%s2424_s8 + $0x38] sm:$0xff] }
  0x38   : > { %v1234_v52 = vld [vmem:[%s2424_s8 + $0x30] sm:$0xff]  ;;  %v1233_v53 = vld [vmem:[%s2424_s8 + $0x28] sm:$0xff]  ;;  %v1232_v54 = vld [vmem:[%s2424_s8 + $0x20] sm:$0xff] }
  0x39   : > { %v1231_v55 = vld [vmem:[%s2424_s8 + $0x18] sm:$0xff]  ;;  %v1230_v56 = vld [vmem:[%s2424_s8 + $0x10] sm:$0xff]  ;;  %v1229_v57 = vld [vmem:[%s2424_s8 + $0x8] sm:$0xff] }
  0x3a   : > { %758 = vperm.xlu1 %1872, %v676_v18   ;;  %753 = vperm.xlu0 %1871, %v675_v19   ;;  %v1228_v58 = vld [vmem:[%s2424_s8] sm:$0xff]  ;;  %v1388_v59 = vld [vmem:[%s2426_s10 + $0x18] sm:$0xff]  ;;  %v1387_v60 = vld [vmem:[%s2426_s10 + $0x10] sm:$0xff] }
  0x3b   : > { %1726 = vmatmul.mubr.msk.bf16.gmra.mxu0 %vm559_vm0, %v1876_v20  ;;  %v1386_v61 = vld [vmem:[%s2426_s10 + $0x8] sm:$0xff]  ;;  %v1385_v62 = vld [vmem:[%s2426_s10] sm:$0xff] }
  0x3c   : > { %v1483_v63 = vld [vmem:[#allocation2] sm:$0x1] }
  0x3d   : > { %v1877_v0 = vld [vmem:[%s2419_s3] sm:$0xff]  }
  0x3e   : > { %748 = vperm.xlu1 %1872, %v674_v21   ;;  %743 = vperm.xlu0 %1871, %v673_v22  }
  0x3f   : > { %1737 = vmatprep.mubr.msk.bf16.mxu1 %vm801_vm1, %v1877_v0 }
  0x42   : > { %738 = vperm.xlu1 %1872, %v672_v23   ;;  %733 = vperm.xlu0 %1871, %v671_v24  }
  0x46   : > { %728 = vperm.xlu1 %1872, %v670_v25   ;;  %723 = vperm.xlu0 %1871, %v669_v26  }
  0x4a   : > { %718 = vperm.xlu1 %1872, %v668_v27   ;;  %713 = vperm.xlu0 %1871, %v667_v28  }
  0x4e   : > { %708 = vperm.xlu1 %1872, %v666_v29   ;;  %703 = vperm.xlu0 %1871, %v665_v30  }
  0x52   : > { %698 = vperm.xlu1 %1872, %v664_v31   ;;  %693 = vperm.xlu0 %1871, %v663_v32  }
  0x56   : > { %688 = vperm.xlu1 %1872, %v662_v33   ;;  %683 = vperm.xlu0 %1871, %v661_v34  }
  0x5a   : > { %1056 = vperm.xlu1 %1872, %v970_v35   ;;  %1051 = vperm.xlu0 %1871, %v969_v36  }
  0x5e   : > { %1046 = vperm.xlu1 %1872, %v968_v37   ;;  %1041 = vperm.xlu0 %1871, %v967_v38   ;;  %v1878_v37 = vld [vmem:[%s2419_s3 + $0x8] sm:$0xff]   ;;  %v1879_v38 = vld [vmem:[%s2419_s3 + $0x10] sm:$0xff]  }
  0x62   : > { %1036 = vperm.xlu1 %1872, %v966_v39   ;;  %1031 = vperm.xlu0 %1871, %v965_v40   ;;  %v1880_v39 = vld [vmem:[%s2419_s3 + $0x18] sm:$0xff]   ;;  %v1881_v40 = vld [vmem:[%s2419_s3 + $0x20] sm:$0xff]  }
  0x66   : > { %1026 = vperm.xlu1 %1872, %v964_v41   ;;  %1021 = vperm.xlu0 %1871, %v963_v42   ;;  %v1882_v41 = vld [vmem:[%s2419_s3 + $0x28] sm:$0xff]   ;;  %v1883_v42 = vld [vmem:[%s2419_s3 + $0x30] sm:$0xff]  }
  0x6a   : > { %1016 = vperm.xlu1 %1872, %v962_v43   ;;  %1011 = vperm.xlu0 %1871, %v961_v44   ;;  %v1884_v43 = vld [vmem:[%s2419_s3 + $0x38] sm:$0xff]   ;;  %v1885_v44 = vld [vmem:[%s2421_s5] sm:$0xff]  }
  0x6b   : > { %1769 = vmatprep.mubr.bf16.mxu0 %v1885_v44 }
  0x6e   : > { %1006 = vperm.xlu1 %1872, %v960_v45   ;;  %1001 = vperm.xlu0 %1871, %v959_v46  }
  0x72   : > { %996 = vperm.xlu1 %1872, %v958_v47   ;;  %991 = vperm.xlu0 %1871, %v957_v48  }
  0x76   : > { %986 = vperm.xlu1 %1872, %v956_v49   ;;  %981 = vperm.xlu0 %1871, %v955_v50  }
  0x7a   : > { %1281 = vperm.xlu1 %1872, %v1235_v51   ;;  %1276 = vperm.xlu0 %1871, %v1234_v52  }
  0x7e   : > { %1271 = vperm.xlu1 %1872, %v1233_v53   ;;  %1266 = vperm.xlu0 %1871, %v1232_v54  }
  0x82   : > { %1261 = vperm.xlu1 %1872, %v1231_v55   ;;  %1256 = vperm.xlu0 %1871, %v1230_v56  }
  0x86   : > { %1251 = vperm.xlu1 %1872, %v1229_v57   ;;  %1246 = vperm.xlu0 %1871, %v1228_v58  }
  0x8a   : > { %1410 = vperm.xlu1 %1872, %v1388_v59   ;;  %1405 = vperm.xlu0 %1871, %v1387_v60  }
  0x8e   : > { %1400 = vperm.xlu1 %1872, %v1386_v61   ;;  %1395 = vperm.xlu0 %1871, %v1385_v62  }
  0x92   : > { %1488 = vperm.xlu0 %1871, %v1483_v63  }
  0xa5   : > { %v522_v1 = vpop.permute.xlu1 %521  ;;  %v532_v3 = vpop.permute.xlu0 %531 }
  0xa9   : > { %v527_v6 = vpop.permute.xlu1 %526  ;;  %v537_v8 = vpop.permute.xlu0 %536 }
  0xad   : > { %v517_v12 = vpop.permute.xlu1 %516  ;;  %v512_v16 = vpop.permute.xlu0 %511 }
  0xb1   : > { %v507_v26 = vpop.permute.xlu1 %506  ;;  %v502_v30 = vpop.permute.xlu0 %501 }
  0xb5   : > { %v759_v49 = vpop.permute.xlu1 %758  ;;  %v754_v51 = vpop.permute.xlu0 %753 }
  0xb9   : > { %v749_v54 = vpop.permute.xlu1 %748  ;;  %v744_v56 = vpop.permute.xlu0 %743 }
  0xbd   : > { %v739_v59 = vpop.permute.xlu1 %738  ;;  %v734_v61 = vpop.permute.xlu0 %733 }
  0xc1   : > { %v729_v0 = vpop.permute.xlu1 %728 }
  0xf3   : > { %v1723_v2 = vpop.f32.mrf.mxu0 }
  0xf4   : > { %v615_v22 = vadd.f32 %v1723_v2, %v512_v16 }
  0xf5   : > { %v606_v4 = vpop.f32.mrf.mxu0 }
  0xf6   : > { %v639_v31 = vmax.f32 %v615_v22, 0.0  ;;  %v607_v32 = vadd.f32 %v606_v4, %v502_v30 }
  0xf7   : > { %v1724_v5 = vpop.f32.mrf.mxu0 }
  0xf8   : > { %v618_v18 = vadd.f32 %v1724_v5, %v517_v12  ;;  %v637_v35 = vmax.f32 %v607_v32, 0.0  ;;  %v719_v12 = vpop.permute.xlu1 %718 }
  0xf9   : > { %v609_v7 = vpop.f32.mrf.mxu0 }
  0xfa   : > { %v640_v27 = vmax.f32 %v618_v18, 0.0  ;;  %v610_v28 = vadd.f32 %v609_v7, %v507_v26 }
  0xfb   : > { %v1727_v9 = vpop.f32.mrf.mxu0 }
  0xfc   : > { %v631_v11 = vadd.f32 %v1727_v9, %v532_v3  ;;  %v678_v33 = vpack.c.bf16 %v640_v27, %v639_v31  ;;  %v638_v34 = vmax.f32 %v610_v28, 0.0  ;;  %v724_v3 = vpop.permute.xlu0 %723 }
  0xfd   : > { %v622_v10 = vpop.f32.mrf.mxu0 }
  0xfe   : > { %v623_v14 = vadd.f32 %v622_v10, %v522_v1  ;;  %v643_v19 = vmax.f32 %v631_v11, 0.0  ;;  %v677_v36 = vpack.c.bf16 %v638_v34, %v637_v35 }
  0xff   : > { %v1728_v13 = vpop.f32.mrf.mxu0 }
 0x100   : > { %v634_v15 = vadd.f32 %v1728_v13, %v537_v8  ;;  %v641_v23 = vmax.f32 %v623_v14, 0.0 }
 0x101   : > { %v625_v17 = vpop.f32.mrf.mxu0 }
 0x102   : > { %v644_v20 = vmax.f32 %v634_v15, 0.0  ;;  %v626_v21 = vadd.f32 %v625_v17, %v527_v6  ;;  %v714_v17 = vpop.permute.xlu0 %713 }
 0x104   : > { %v642_v24 = vmax.f32 %v626_v21, 0.0  ;;  %v680_v25 = vpack.c.bf16 %v644_v20, %v643_v19 }
 0x106   : > { %v679_v29 = vpack.c.bf16 %v642_v24, %v641_v23  ;;  %1729 = vmatprep.subr.bf16.mxu1 %v680_v25  ;;  %v709_v23 = vpop.permute.xlu1 %708  ;;  %v704_v27 = vpop.permute.xlu0 %703 }
 0x107   : > { %1730 = vmatpush3.bf16.msra.mxu1 %v680_v25 }
 0x108   : > { %1731 = vmatprep.subr.bf16.mxu1 %v679_v29 }
 0x10b   : > { %1732 = vmatpush3.bf16.msra.mxu1 %v679_v29 }
 0x10c   : > { %1733 = vmatprep.subr.bf16.mxu1 %v678_v33 }
 0x10f   : > { %1734 = vmatpush3.bf16.msra.mxu1 %v678_v33  ;;  %v699_v33 = vpop.permute.xlu1 %698 }
 0x110   : > { %1735 = vmatprep.subr.bf16.mxu1 %v677_v36 }
 0x113   : > { %1736 = vmatpush3.bf16.msra.mxu1 %v677_v36  ;;  %v694_v36 = vpop.permute.xlu0 %693 }
 0x116   : > { %1738 = vmatmul.mubr.msk.bf16.vlgmr.msra.gmra.mxu1 %vm801_vm1, %v1878_v37 }
 0x117   : > { %1741 = vmatprep.mubr.msk.bf16.mxu1 %vm801_vm1, %v1879_v38 }
 0x11e   : > { %1742 = vmatmul.mubr.msk.bf16.gmra.mxu1 %vm801_vm1, %v1880_v39 }
 0x11f   : > { %1745 = vmatprep.mubr.msk.bf16.mxu1 %vm801_vm1, %v1881_v40 }
 0x126   : > { %1746 = vmatmul.mubr.msk.bf16.gmra.mxu1 %vm801_vm1, %v1882_v41 }
 0x127   : > { %1749 = vmatprep.mubr.msk.bf16.mxu1 %vm801_vm1, %v1883_v42  ;;  %v689_v42 = vpop.permute.xlu1 %688 }
 0x12e   : > { %1750 = vmatmul.mubr.msk.bf16.gmra.mxu1 %vm801_vm1, %v1884_v43 }
 0x1d6   : > { %v2305_v45 = vpop.f32.mrf.mxu1 }
 0x1d7   : > { %v869_v40 = vadd.f32 %v2305_v45, %v694_v36  ;;  %v1886_v45 = vld [vmem:[%s2421_s5 + $0x8] sm:$0xff]  }
 0x1d8   : > { %v2307_v46 = vpop.f32.mrf.mxu1 }
 0x1da   : > { %v1740_v47 = vpop.f32.mrf.mxu1 }
 0x1db   : > { %v872_v37 = vadd.f32 %v1740_v47, %v699_v33 }
 0x1dc   : > { %v2309_v48 = vpop.f32.mrf.mxu1 }
 0x1dd   : > { %v926_v43 = vmax.f32 %v872_v37, 0.0  ;;  %v864_v44 = vadd.f32 %v2309_v48, %v689_v42  ;;  %v1887_v48 = vld [vmem:[%s2421_s5 + $0x10] sm:$0xff]  }
 0x1de   : > { %v1743_v50 = vpop.f32.mrf.mxu1 }
 0x1df   : > { %v885_v28 = vadd.f32 %v1743_v50, %v714_v17  ;;  %v684_v50 = vpop.permute.xlu0 %683  ;;  %v924_v47 = vmax.f32 %v864_v44, 0.0 }
 0x1e0   : > { %v876_v52 = vpop.f32.mrf.mxu1 }
 0x1e1   : > { %v929_v34 = vmax.f32 %v885_v28, 0.0  ;;  %v877_v35 = vadd.f32 %v876_v52, %v704_v27  ;;  %v861_v52 = vadd.f32 %v2307_v46, %v684_v50  ;;  %v1888_v46 = vld [vmem:[%s2421_s5 + $0x18] sm:$0xff]  }
 0x1e2   : > { %v1744_v53 = vpop.f32.mrf.mxu1 }
 0x1e3   : > { %v888_v24 = vadd.f32 %v1744_v53, %v719_v12  ;;  %v927_v41 = vmax.f32 %v877_v35, 0.0 }
 0x1e4   : > { %v879_v55 = vpop.f32.mrf.mxu1 }
 0x1e5   : > { %v930_v30 = vmax.f32 %v888_v24, 0.0  ;;  %v880_v31 = vadd.f32 %v879_v55, %v709_v23 }
 0x1e6   : > { %v1747_v57 = vpop.f32.mrf.mxu1 }
 0x1e7   : > { %v901_v13 = vadd.f32 %v1747_v57, %v734_v61  ;;  %v974_v38 = vpack.c.bf16 %v930_v30, %v929_v34  ;;  %v928_v39 = vmax.f32 %v880_v31, 0.0  ;;  %v1890_v57 = vld [vmem:[%s2421_s5 + $0x28] sm:$0xff]  }
 0x1e8   : > { %v892_v58 = vpop.f32.mrf.mxu1 }
 0x1e9   : > { %v933_v21 = vmax.f32 %v901_v13, 0.0  ;;  %v893_v22 = vadd.f32 %v892_v58, %v724_v3  ;;  %v1891_v58 = vld [vmem:[%s2421_s5 + $0x30] sm:$0xff]   ;;  %v1052_v3 = vpop.permute.xlu0 %1051 }
 0x1ea   : > { %v1748_v60 = vpop.f32.mrf.mxu1 }
 0x1eb   : > { %v904_v8 = vadd.f32 %v1748_v60, %v739_v59  ;;  %v931_v29 = vmax.f32 %v893_v22, 0.0  ;;  %v1892_v59 = vld [vmem:[%s2421_s5 + $0x38] sm:$0xff]   ;;  %v1893_v60 = vld [vmem:[%s2423_s7] sm:$0xff]  }
 0x1ec   : > { %v895_v62 = vpop.f32.mrf.mxu1  ;;  %1801 = vmatprep.mubr.bf16.mxu1 %v1893_v60 }
 0x1ed   : > { %v934_v18 = vmax.f32 %v904_v8, 0.0  ;;  %v896_v19 = vadd.f32 %v895_v62, %v729_v0  ;;  %v1042_v8 = vpop.permute.xlu0 %1041 }
 0x1ee   : > { %v1751_v63 = vpop.f32.mrf.mxu1 }
 0x1ef   : > { %v917_v2 = vadd.f32 %v1751_v63, %v754_v51  ;;  %v976_v25 = vpack.c.bf16 %v934_v18, %v933_v21  ;;  %v932_v26 = vmax.f32 %v896_v19, 0.0  ;;  %v925_v51 = vmax.f32 %v869_v40, 0.0 }
 0x1f0   : > { %v908_v1 = vpop.f32.mrf.mxu1 }
 0x1f1   : > { %v909_v5 = vadd.f32 %v908_v1, %v744_v56  ;;  %v937_v9 = vmax.f32 %v917_v2, 0.0  ;;  %v975_v32 = vpack.c.bf16 %v932_v26, %v931_v29  ;;  %v972_v53 = vpack.c.bf16 %v926_v43, %v925_v51  ;;  %v1889_v56 = vld [vmem:[%s2421_s5 + $0x20] sm:$0xff]   ;;  %v1057_v1 = vpop.permute.xlu1 %1056  ;;  %v1032_v13 = vpop.permute.xlu0 %1031 }
 0x1f2   : > { %v1752_v4 = vpop.f32.mrf.mxu1 }
 0x1f3   : > { %v920_v6 = vadd.f32 %v1752_v4, %v759_v49  ;;  %v935_v14 = vmax.f32 %v909_v5, 0.0  ;;  %v973_v49 = vpack.c.bf16 %v928_v39, %v927_v41 }
 0x1f4   : > { %v911_v7 = vpop.f32.mrf.mxu1 }
 0x1f5   : > { %v938_v10 = vmax.f32 %v920_v6, 0.0  ;;  %v912_v11 = vadd.f32 %v911_v7, %v749_v54  ;;  %v923_v54 = vmax.f32 %v861_v52, 0.0  ;;  %v1047_v6 = vpop.permute.xlu1 %1046  ;;  %v1022_v19 = vpop.permute.xlu0 %1021 }
 0x1f7   : > { %v978_v15 = vpack.c.bf16 %v938_v10, %v937_v9  ;;  %v936_v16 = vmax.f32 %v912_v11, 0.0  ;;  %v971_v55 = vpack.c.bf16 %v924_v47, %v923_v54 }
 0x1f9   : > { %v977_v20 = vpack.c.bf16 %v936_v16, %v935_v14  ;;  %1753 = vmatprep.subr.bf16.mxu0 %v978_v15  ;;  %v1037_v11 = vpop.permute.xlu1 %1036  ;;  %v1012_v33 = vpop.permute.xlu0 %1011 }
 0x1fa   : > { %1754 = vmatpush3.bf16.msra.mxu0 %v978_v15 }
 0x1fb   : > { %1755 = vmatprep.subr.bf16.mxu0 %v977_v20 }
 0x1fd   : > { %v1027_v16 = vpop.permute.xlu1 %1026  ;;  %v1002_v43 = vpop.permute.xlu0 %1001 }
 0x1fe   : > { %1756 = vmatpush3.bf16.msra.mxu0 %v977_v20 }
 0x1ff   : > { %1757 = vmatprep.subr.bf16.mxu0 %v976_v25 }
 0x201   : > { %v1017_v28 = vpop.permute.xlu1 %1016 }
 0x202   : > { %1758 = vmatpush3.bf16.msra.mxu0 %v976_v25 }
 0x203   : > { %1759 = vmatprep.subr.bf16.mxu0 %v975_v32 }
 0x205   : > { %v1007_v39 = vpop.permute.xlu1 %1006 }
 0x206   : > { %1760 = vmatpush3.bf16.msra.mxu0 %v975_v32 }
 0x207   : > { %1761 = vmatprep.subr.bf16.mxu0 %v974_v38 }
 0x20a   : > { %1762 = vmatpush3.bf16.msra.mxu0 %v974_v38 }
 0x20b   : > { %1763 = vmatprep.subr.bf16.mxu0 %v973_v49 }
 0x20e   : > { %1764 = vmatpush3.bf16.msra.mxu0 %v973_v49 }
 0x20f   : > { %1765 = vmatprep.subr.bf16.mxu0 %v972_v53 }
 0x212   : > { %1766 = vmatpush3.bf16.msra.mxu0 %v972_v53  ;;  %v997_v53 = vpop.permute.xlu1 %996 }
 0x213   : > { %1767 = vmatprep.subr.bf16.mxu0 %v971_v55 }
 0x216   : > { %1768 = vmatpush3.bf16.msra.mxu0 %v971_v55  ;;  %v992_v55 = vpop.permute.xlu0 %991 }
 0x219   : > { %1770 = vmatmul.mubr.bf16.vlgmr.msra.gmra.mxu0 %v1886_v45 }
 0x21a   : > { %1773 = vmatprep.mubr.bf16.mxu0 %v1887_v48 }
 0x221   : > { %1774 = vmatmul.mubr.bf16.gmra.mxu0 %v1888_v46 }
 0x222   : > { %1777 = vmatprep.mubr.bf16.mxu0 %v1889_v56 }
 0x229   : > { %1778 = vmatmul.mubr.bf16.gmra.mxu0 %v1890_v57 }
 0x22a   : > { %1781 = vmatprep.mubr.bf16.mxu0 %v1891_v58  ;;  %v987_v58 = vpop.permute.xlu1 %986 }
 0x231   : > { %1782 = vmatmul.mubr.bf16.gmra.mxu0 %v1892_v59 }
 0x2d9   : > { %v2338_v61 = vpop.f32.mrf.mxu0 }
 0x2da   : > { %v1150_v56 = vadd.f32 %v2338_v61, %v992_v55  ;;  %v1894_v61 = vld [vmem:[%s2423_s7 + $0x8] sm:$0xff]  }
 0x2db   : > { %v2340_v62 = vpop.f32.mrf.mxu0 }
 0x2dd   : > { %v1772_v63 = vpop.f32.mrf.mxu0 }
 0x2de   : > { %v1153_v45 = vadd.f32 %v1772_v63, %v997_v53 }
 0x2df   : > { %v2342_v0 = vpop.f32.mrf.mxu0 }
 0x2e0   : > { %v1207_v59 = vmax.f32 %v1153_v45, 0.0  ;;  %v1145_v60 = vadd.f32 %v2342_v0, %v987_v58  ;;  %v1895_v0 = vld [vmem:[%s2423_s7 + $0x10] sm:$0xff]  }
 0x2e1   : > { %v1775_v2 = vpop.f32.mrf.mxu0 }
 0x2e2   : > { %v1166_v44 = vadd.f32 %v1775_v2, %v1012_v33  ;;  %v982_v2 = vpop.permute.xlu0 %981  ;;  %v1205_v63 = vmax.f32 %v1145_v60, 0.0 }
 0x2e3   : > { %v1157_v4 = vpop.f32.mrf.mxu0 }
 0x2e4   : > { %v1210_v47 = vmax.f32 %v1166_v44, 0.0  ;;  %v1158_v54 = vadd.f32 %v1157_v4, %v1002_v43  ;;  %v1142_v4 = vadd.f32 %v2340_v62, %v982_v2  ;;  %v1896_v62 = vld [vmem:[%s2423_s7 + $0x18] sm:$0xff]  }
 0x2e5   : > { %v1776_v5 = vpop.f32.mrf.mxu0 }
 0x2e6   : > { %v1169_v40 = vadd.f32 %v1776_v5, %v1017_v28  ;;  %v1208_v57 = vmax.f32 %v1158_v54, 0.0 }
 0x2e7   : > { %v1160_v7 = vpop.f32.mrf.mxu0 }
 0x2e8   : > { %v1211_v50 = vmax.f32 %v1169_v40, 0.0  ;;  %v1161_v51 = vadd.f32 %v1160_v7, %v1007_v39 }
 0x2e9   : > { %v1779_v9 = vpop.f32.mrf.mxu0 }
 0x2ea   : > { %v1182_v29 = vadd.f32 %v1779_v9, %v1032_v13  ;;  %v1239_v48 = vpack.c.bf16 %v1211_v50, %v1210_v47  ;;  %v1209_v46 = vmax.f32 %v1161_v51, 0.0  ;;  %v1282_v9 = vpop.permute.xlu1 %1281  ;;  %v1962_v50 = vmov 0.0  }
 0x2eb   : > { %v1173_v10 = vpop.f32.mrf.mxu0  ;;  %1821 = vmatprep.subr.bf16.mxu0 %v1962_v50  ;;  %1825 = vmatprep.mubr.msk.bf16.mxu0 %vm1963_vm2, %v1962_v50 }
 0x2ec   : > { %v1214_v37 = vmax.f32 %v1182_v29, 0.0  ;;  %v1174_v38 = vadd.f32 %v1173_v10, %v1022_v19 }
 0x2ed   : > { %v1780_v12 = vpop.f32.mrf.mxu0 }
 0x2ee   : > { %v1185_v24 = vadd.f32 %v1780_v12, %v1037_v11  ;;  %v1212_v49 = vmax.f32 %v1174_v38, 0.0  ;;  %v1277_v11 = vpop.permute.xlu0 %1276 }
 0x2ef   : > { %v1176_v14 = vpop.f32.mrf.mxu0 }
 0x2f0   : > { %v1215_v34 = vmax.f32 %v1185_v24, 0.0  ;;  %v1177_v35 = vadd.f32 %v1176_v14, %v1027_v16  ;;  %v1272_v14 = vpop.permute.xlu1 %1271 }
 0x2f1   : > { %v1783_v15 = vpop.f32.mrf.mxu0 }
 0x2f2   : > { %v1198_v18 = vadd.f32 %v1783_v15, %v1052_v3  ;;  %v1241_v41 = vpack.c.bf16 %v1215_v34, %v1214_v37  ;;  %v1213_v42 = vmax.f32 %v1177_v35, 0.0  ;;  %v1206_v3 = vmax.f32 %v1150_v56, 0.0  ;;  %v1267_v16 = vpop.permute.xlu0 %1266 }
 0x2f3   : > { %v1189_v17 = vpop.f32.mrf.mxu0 }
 0x2f4   : > { %v1190_v21 = vadd.f32 %v1189_v17, %v1042_v8  ;;  %v1218_v25 = vmax.f32 %v1198_v18, 0.0  ;;  %v1240_v52 = vpack.c.bf16 %v1213_v42, %v1212_v49  ;;  %v1237_v5 = vpack.c.bf16 %v1207_v59, %v1206_v3  ;;  %v1897_v8 = vld [vmem:[%s2425_s9] sm:$0xff]   ;;  %v1898_v49 = vld [vmem:[%s2425_s9 + $0x8] sm:$0xff]  }
 0x2f5   : > { %v1784_v20 = vpop.f32.mrf.mxu0 }
 0x2f6   : > { %v1201_v22 = vadd.f32 %v1784_v20, %v1057_v1  ;;  %v1216_v30 = vmax.f32 %v1190_v21, 0.0  ;;  %v1238_v1 = vpack.c.bf16 %v1209_v46, %v1208_v57  ;;  %v1262_v20 = vpop.permute.xlu1 %1261  ;;  %v1257_v24 = vpop.permute.xlu0 %1256 }
 0x2f7   : > { %v1192_v23 = vpop.f32.mrf.mxu0 }
 0x2f8   : > { %v1219_v26 = vmax.f32 %v1201_v22, 0.0  ;;  %v1193_v27 = vadd.f32 %v1192_v23, %v1047_v6  ;;  %v1204_v6 = vmax.f32 %v1142_v4, 0.0 }
 0x2fa   : > { %v1243_v31 = vpack.c.bf16 %v1219_v26, %v1218_v25  ;;  %v1217_v32 = vmax.f32 %v1193_v27, 0.0  ;;  %v1236_v7 = vpack.c.bf16 %v1205_v63, %v1204_v6  ;;  %v1252_v34 = vpop.permute.xlu1 %1251  ;;  %v1247_v38 = vpop.permute.xlu0 %1246  ;;  %v1491_v63 = vlaneseq }
 0x2fc   : > { %v1242_v36 = vpack.c.bf16 %v1217_v32, %v1216_v30  ;;  %1785 = vmatprep.subr.bf16.mxu1 %v1243_v31  ;;  %v1492_v6 = vshrl.u32 %v1491_v63, 7 }
 0x2fd   : > { %1786 = vmatpush3.bf16.msra.mxu1 %v1243_v31 }
 0x2fe   : > { %1787 = vmatprep.subr.bf16.mxu1 %v1242_v36  ;;  %v1411_v51 = vpop.permute.xlu1 %1410 }
 0x301   : > { %1788 = vmatpush3.bf16.msra.mxu1 %v1242_v36 }
 0x302   : > { %1789 = vmatprep.subr.bf16.mxu1 %v1241_v41  ;;  %v1401_v45 = vpop.permute.xlu1 %1400 }
 0x305   : > { %1790 = vmatpush3.bf16.msra.mxu1 %v1241_v41 }
 0x306   : > { %1791 = vmatprep.subr.bf16.mxu1 %v1240_v52 }
 0x309   : > { %1792 = vmatpush3.bf16.msra.mxu1 %v1240_v52  ;;  %v1406_v52 = vpop.permute.xlu0 %1405 }
 0x30a   : > { %1793 = vmatprep.subr.bf16.mxu1 %v1239_v48 }
 0x30d   : > { %1794 = vmatpush3.bf16.msra.mxu1 %v1239_v48  ;;  %v1396_v46 = vpop.permute.xlu0 %1395 }
 0x30e   : > { %1795 = vmatprep.subr.bf16.mxu1 %v1238_v1 }
 0x311   : > { %1796 = vmatpush3.bf16.msra.mxu1 %v1238_v1 }
 0x312   : > { %1797 = vmatprep.subr.bf16.mxu1 %v1237_v5 }
 0x315   : > { %1798 = vmatpush3.bf16.msra.mxu1 %v1237_v5  ;;  %v1482_v5 = vld [vmem:[%s2427_s11] sm:$0x1] }
 0x316   : > { %1799 = vmatprep.subr.bf16.mxu1 %v1236_v7 }
 0x319   : > { %1800 = vmatpush3.bf16.msra.mxu1 %v1236_v7  ;;  %v1493_v7 = vsub.s32 0, %v1492_v6 }
 0x31c   : > { %1802 = vmatmul.mubr.bf16.vlgmr.msra.gmra.mxu1 %v1894_v61  ;;  %v1489_v61 = vpop.permute.xlu0 %1488 }
 0x31d   : > { %1805 = vmatprep.mubr.bf16.mxu1 %v1895_v0  ;;  %v1494_v0 = vrot.slane %v1489_v61, %v1493_v7 }
 0x324   : > { %1806 = vmatmul.mubr.bf16.gmra.mxu1 %v1896_v62 }
 0x325   : > { %1817 = vmatprep.mubr.msk.bf16.mxu1 %vm801_vm1, %v1897_v8 }
 0x3dc   : > { %v1803_v10 = vpop.f32.mrf.mxu1 }
 0x3dd   : > { %v1351_v30 = vadd.f32 %v1803_v10, %v1257_v24 }
 0x3de   : > { %v1342_v12 = vpop.f32.mrf.mxu1 }
 0x3df   : > { %v1375_v39 = vmax.f32 %v1351_v30, 0.0  ;;  %v1343_v40 = vadd.f32 %v1342_v12, %v1247_v38 }
 0x3e0   : > { %v1804_v13 = vpop.f32.mrf.mxu1 }
 0x3e1   : > { %v1354_v26 = vadd.f32 %v1804_v13, %v1262_v20  ;;  %v1373_v43 = vmax.f32 %v1343_v40, 0.0 }
 0x3e2   : > { %v1345_v15 = vpop.f32.mrf.mxu1 }
 0x3e3   : > { %v1376_v35 = vmax.f32 %v1354_v26, 0.0  ;;  %v1346_v36 = vadd.f32 %v1345_v15, %v1252_v34 }
 0x3e4   : > { %v1807_v17 = vpop.f32.mrf.mxu1 }
 0x3e5   : > { %v1367_v19 = vadd.f32 %v1807_v17, %v1277_v11  ;;  %v1390_v41 = vpack.c.bf16 %v1376_v35, %v1375_v39  ;;  %v1374_v42 = vmax.f32 %v1346_v36, 0.0 }
 0x3e6   : > { %v1358_v18 = vpop.f32.mrf.mxu1 }
 0x3e7   : > { %v1359_v22 = vadd.f32 %v1358_v18, %v1267_v16  ;;  %v1379_v27 = vmax.f32 %v1367_v19, 0.0  ;;  %v1389_v44 = vpack.c.bf16 %v1374_v42, %v1373_v43 }
 0x3e8   : > { %v1808_v21 = vpop.f32.mrf.mxu1 }
 0x3e9   : > { %v1370_v23 = vadd.f32 %v1808_v21, %v1282_v9  ;;  %v1377_v31 = vmax.f32 %v1359_v22, 0.0 }
 0x3ea   : > { %v1361_v25 = vpop.f32.mrf.mxu1 }
 0x3eb   : > { %v1380_v28 = vmax.f32 %v1370_v23, 0.0  ;;  %v1362_v29 = vadd.f32 %v1361_v25, %v1272_v14 }
 0x3ed   : > { %v1392_v32 = vpack.c.bf16 %v1380_v28, %v1379_v27  ;;  %v1378_v33 = vmax.f32 %v1362_v29, 0.0 }
 0x3ef   : > { %v1391_v37 = vpack.c.bf16 %v1378_v33, %v1377_v31  ;;  %1809 = vmatprep.subr.bf16.mxu1 %v1392_v32 }
 0x3f0   : > { %1810 = vmatpush3.bf16.msra.mxu1 %v1392_v32 }
 0x3f1   : > { %1811 = vmatprep.subr.bf16.mxu1 %v1391_v37 }
 0x3f4   : > { %1812 = vmatpush3.bf16.msra.mxu1 %v1391_v37 }
 0x3f5   : > { %1813 = vmatprep.subr.bf16.mxu1 %v1390_v41 }
 0x3f8   : > { %1814 = vmatpush3.bf16.msra.mxu1 %v1390_v41 }
 0x3f9   : > { %1815 = vmatprep.subr.bf16.mxu1 %v1389_v44 }
 0x3fc   : > { %1816 = vmatpush3.bf16.msra.mxu1 %v1389_v44 }
 0x3ff   : > { %1818 = vmatmul.mubr.msk.bf16.vlgmr.msra.gmra.mxu1 %vm801_vm1, %v1898_v49 }
 0x4bf   : > { %v1819_v53 = vpop.f32.mrf.mxu1 }
 0x4c0   : > { %v1472_v54 = vadd.f32 %v1819_v53, %v1406_v52 }
 0x4c1   : > { %v1463_v47 = vpop.f32.mrf.mxu1 }
 0x4c2   : > { %v1480_v57 = vmax.f32 %v1472_v54, 0.0  ;;  %v1464_v58 = vadd.f32 %v1463_v47, %v1396_v46 }
 0x4c3   : > { %v1820_v55 = vpop.f32.mrf.mxu1 }
 0x4c4   : > { %v1475_v48 = vadd.f32 %v1820_v55, %v1411_v51  ;;  %v1478_v3 = vmax.f32 %v1464_v58, 0.0 }
 0x4c5   : > { %v1466_v56 = vpop.f32.mrf.mxu1 }
 0x4c6   : > { %v1481_v59 = vmax.f32 %v1475_v48, 0.0  ;;  %v1467_v60 = vadd.f32 %v1466_v56, %v1401_v45 }
 0x4c8   : > { %v1485_v1 = vpack.c.bf16 %v1481_v59, %v1480_v57  ;;  %v1479_v2 = vmax.f32 %v1467_v60, 0.0 }
 0x4ca   : > { %1822 = vmatpush3.bf16.msra.mxu0 %v1485_v1  ;;  %v1484_v4 = vpack.c.bf16 %v1479_v2, %v1478_v3 }
 0x4cb   : > { %1823 = vmatprep.subr.bf16.mxu0 %v1962_v50 }
 0x4ce   : > { %1824 = vmatpush3.bf16.msra.mxu0 %v1484_v4 }
 0x4d1   : > { %1826 = vmatmul.mubr.msk.bf16.vlgmr.msra.gmra.mxu0 %vm1495_vm3, %v1482_v5 }
 0x591   : > { %v1533_v62 = vpop.f32.mrf.mxu0 }
 0x592   : > { %v1534_v8 = vadd.f32 %v1533_v62, %v1494_v0 }
 0x593   : > { %v1827_v9 = vpop.f32.mrf.mxu0 }
 0x594   : > { %1539 = vst [vmem:[%s478_s21] sm:$0x1] %v1534_v8 }
 0x595   : > { %v1536_v10 = vpop.f32.mrf.mxu0 }
 0x596   : > { %1912 = shalt.err (!%p1909_p5)
}
 0x597   : > { %s1913_s12 = scalar_lea.hbm %s2373_s14, 16  ;;  %s1917_s26 = scalar_lea.hbm %s2429_s13, 32 }
 0x598   : > { %p1914_p7 = scmp.ne.s32.totalorder %s2373_s14, %s1913_s12  ;;  %p1918_p12 = scmp.lt.s32.totalorder %s2373_s14, %s2429_s13 }
 0x599   : > { %p1919_p13 = scmp.lt.s32.totalorder %s1917_s26, %s1913_s12 }
 0x59a   : > { %p1915_p10 = pnand %p1914_p7, %p2076_p6 }
 0x59b   : > { %p1920_p0 = por %p1919_p13, %p1918_p12 }
 0x59c   : > { %p1916_p11 = pneg %p1915_p10 }
 0x59e   : > { %p1921_p1 = pnand %p1920_p0, %p1916_p11 }
 0x5a0   : > { %1924 = shalt.err (!%p1921_p1)
}
 0x5a1   : > { %1829 = dma.vmem_to_hbm [thread:$0]  (%p2076_p6), %s2375_s22, 16, %s2373_s14, %s1541_s16   ;;  %v1828_v11 = vpop.f32.mrf.mxu0 }
 0x5a2 PF: > { %s1565_s24 = sand.u32 1, %s1947_s27   ;;  %p1832_p2 = pnand %p1616_p9, %p2080_p8 }
 0x5a3   : > { %s1566_s1 = scalar_lea.sflag [#allocation5], %s1565_s24 }
 0x5a4   : > { %p1833_p3 = pneg %p1832_p2 }
 0x5a6   : > { %1942 = dma.done.wait (%p1833_p3), %s1566_s1, 16  }
 0x5a7   : > { %1944 = vsyncadd (%p1833_p3), %s1566_s1, 4294967280  ;;  %p25_p4 = scmp.ge.s32.totalorder %s2061_s15, 4   ;;  %s2438_s27 = smov %s1951_s28 }
 0x5a8   : > { %s2439_s28 = smov %s1955_s29  ;;  %s2440_s29 = smov %s2074_s18 }
 0x5a9   : > { %s2441_s30 = smov %s2061_s15  ;;  %27 = sbr.rel (!%p25_p4) target bundleno = 6 (0x6), region = 150 }
 0x5ae   :  { %1570 = vsyncpa [#allocation5], 1 }
 0x5af   :  { %1572 = vsyncpa [#allocation5 + $0x1], 1 }

</bundles_post_ra>
